<compile_context>
chip_gen: v7x
topology: tpu7x:2x2x1
jax: 0.10.0
libtpu: 0.0.40
codegen_flags: <defaults>
</compile_context>

<pallas_src>
import jax
import jax.numpy as jnp
from jax.experimental import pallas as pl
from jax.experimental.pallas import tpu as pltpu

BN_EPS = 1e-5
H1, H2 = 256, 128          # hidden widths
OUT_DIM = 65               # logical output width
OUT_PAD = 128              # lane-dense padded output width


def _round_up(n, m):
    return (n + m - 1) // m * m


# ---------------------------------------------------------------------------
# Kernel: 3 matmuls + 2 ReLUs.  BN is pre-folded, Dropout is identity (eval).
# ---------------------------------------------------------------------------
def _head_kernel(x_ref, w1_ref, w2_ref, w3_ref, bias_ref, o_ref):
    x = x_ref[...]                                    # [tile_b, D]  bf16
    bias = bias_ref[...]                              # [8, 256]     f32 (packed)
    b1 = bias[0:1, :H1]                               # [1, 256]  (BN1-folded)
    b2 = bias[1:2, :H2]                               # [1, 128]  (BN2-folded)
    b3 = bias[2:3, :OUT_PAD]                          # [1, 128]  (zero-padded)

    # Linear(D, 256) with BN1 folded in, then ReLU.  f32 MXU accumulation.
    h = jnp.dot(x, w1_ref[...], preferred_element_type=jnp.float32) + b1
    h = jnp.maximum(h, 0.0)

    # Linear(256, 128) with BN2 folded in, then ReLU.
    h = jnp.dot(h.astype(jnp.bfloat16), w2_ref[...],
                preferred_element_type=jnp.float32) + b2
    h = jnp.maximum(h, 0.0)

    # Linear(128, 65) padded to 128 output lanes -> full unmasked stores.
    out = jnp.dot(h.astype(jnp.bfloat16), w3_ref[...],
                  preferred_element_type=jnp.float32) + b3
    o_ref[...] = out


# ---------------------------------------------------------------------------
# Wrapper: pad batch, build grid, run the kernel, un-pad.
# ---------------------------------------------------------------------------
def fine_tune_head(feature, kp):
    """feature: [B, D] f32 flattened backbone features; kp: prepared kernel params."""
    B, D = feature.shape

    if B >= 128:
        tile_b = 128
        b_pad = _round_up(B, tile_b)
    else:
        tile_b = _round_up(B, 16)      # sublane / bf16-packing friendly single tile
        b_pad = tile_b

    x = feature.astype(jnp.bfloat16)
    if b_pad != B:
        x = jnp.pad(x, ((0, b_pad - B), (0, 0)))

    w1, w2, w3, bias = kp["w1"], kp["w2"], kp["w3"], kp["bias"]

    flops = 2 * b_pad * (D * H1 + H1 * H2 + H2 * OUT_PAD)
    bytes_accessed = (x.size * 2 + w1.size * 2 + w2.size * 2 + w3.size * 2
                      + bias.size * 4 + b_pad * OUT_PAD * 4)

    # TODO(synk): if the real backbone makes D very large (>~16K), K-tile the first
    # matmul (extra "arbitrary" grid axis + f32 VMEM accumulator) so w1 blocks fit
    # v7x's 64 MiB VMEM / v5e's 16 MiB default scoped limit.
    out = pl.pallas_call(
        _head_kernel,
        out_shape=jax.ShapeDtypeStruct((b_pad, OUT_PAD), jnp.float32),
        grid_spec=pltpu.PrefetchScalarGridSpec(
            num_scalar_prefetch=0,
            grid=(b_pad // tile_b,),
            in_specs=[
                pl.BlockSpec((tile_b, D), lambda i: (i, 0)),     # activation stream
                pl.BlockSpec((D, H1), lambda i: (0, 0)),         # VMEM-resident w1
                pl.BlockSpec((H1, H2), lambda i: (0, 0)),        # VMEM-resident w2
                pl.BlockSpec((H2, OUT_PAD), lambda i: (0, 0)),   # VMEM-resident w3
                pl.BlockSpec((8, 256), lambda i: (0, 0)),        # packed biases
            ],
            out_specs=pl.BlockSpec((tile_b, OUT_PAD), lambda i: (i, 0)),
        ),
        compiler_params=pltpu.CompilerParams(
            dimension_semantics=("parallel",)),   # v7x: shard batch tiles over 2 TCs
        cost_estimate=pl.CostEstimate(
            flops=flops, transcendentals=0, bytes_accessed=bytes_accessed),
    )(x, w1, w2, w3, bias)

    return out[:B, :OUT_DIM]


def fine_tune_model_forward(x, kernel_params):
    """Full forward: backbone (identity stand-in) -> flatten -> MLP head."""
    # TODO(synk): `self.net` is an arbitrary external backbone; identity stand-in.
    feature = x.reshape(x.shape[0], -1).astype(jnp.float32)   # NCHW flatten, [B, C*H*W]
    return fine_tune_head(feature, kernel_params)


# ---------------------------------------------------------------------------
# Parameter construction (PyTorch-style) + kernel-side preprocessing.
# ---------------------------------------------------------------------------
def _linear_init(key, fan_in, fan_out):
    """PyTorch-style uniform(-1/sqrt(fan_in), 1/sqrt(fan_in)) init, stored [in, out]."""
    kw, kb = jax.random.split(key)
    bound = 1.0 / jnp.sqrt(jnp.float32(fan_in))
    w = jax.random.uniform(kw, (fan_in, fan_out), jnp.float32, -bound, bound)
    b = jax.random.uniform(kb, (1, fan_out), jnp.float32, -bound, bound)
    return w, b


def make_params(key, input_dim):
    k1, k2, k3, kg1, kb1, kg2, kb2 = jax.random.split(key, 7)
    w1, b1 = _linear_init(k1, input_dim, H1)
    w2, b2 = _linear_init(k2, H1, H2)
    w3, b3 = _linear_init(k3, H2, OUT_DIM)
    # BatchNorm params perturbed (with independent keys) so the BN path is exercised.
    g1 = 1.0 + 0.1 * jax.random.normal(kg1, (1, H1), jnp.float32)
    be1 = 0.1 * jax.random.normal(kb1, (1, H1), jnp.float32)
    g2 = 1.0 + 0.1 * jax.random.normal(kg2, (1, H2), jnp.float32)
    be2 = 0.1 * jax.random.normal(kb2, (1, H2), jnp.float32)
    rm1 = jnp.zeros((1, H1), jnp.float32)
    rv1 = jnp.ones((1, H1), jnp.float32)
    rm2 = jnp.zeros((1, H2), jnp.float32)
    rv2 = jnp.ones((1, H2), jnp.float32)
    return dict(w1=w1, b1=b1, g1=g1, be1=be1, rm1=rm1, rv1=rv1,
                w2=w2, b2=b2, g2=g2, be2=be2, rm2=rm2, rv2=rv2,
                w3=w3, b3=b3)


def prepare_kernel_params(p):
    """Fold eval-mode BN into the linears, pad output layer, pack biases, cast bf16."""
    s1 = p["g1"] * jax.lax.rsqrt(p["rv1"] + BN_EPS)            # [1, 256]
    w1f = p["w1"] * s1
    b1f = (p["b1"] - p["rm1"]) * s1 + p["be1"]
    s2 = p["g2"] * jax.lax.rsqrt(p["rv2"] + BN_EPS)            # [1, 128]
    w2f = p["w2"] * s2
    b2f = (p["b2"] - p["rm2"]) * s2 + p["be2"]

    w3p = jnp.zeros((H2, OUT_PAD), jnp.float32).at[:, :OUT_DIM].set(p["w3"])
    b3p = jnp.zeros((1, OUT_PAD), jnp.float32).at[:, :OUT_DIM].set(p["b3"])

    bias = jnp.zeros((8, 256), jnp.float32)
    bias = bias.at[0, :H1].set(b1f[0])
    bias = bias.at[1, :H2].set(b2f[0])
    bias = bias.at[2, :OUT_PAD].set(b3p[0])

    return dict(w1=w1f.astype(jnp.bfloat16),
                w2=w2f.astype(jnp.bfloat16),
                w3=w3p.astype(jnp.bfloat16),
                bias=bias)


# ---------------------------------------------------------------------------
# References for correctness checks.
# ---------------------------------------------------------------------------
def _reference_exact(x, p):
    """Exact f32, unfolded-BN forward (matches the PyTorch eval-mode math)."""
    f = x.reshape(x.shape[0], -1).astype(jnp.float32)
    h = f @ p["w1"] + p["b1"]
    h = (h - p["rm1"]) / jnp.sqrt(p["rv1"] + BN_EPS) * p["g1"] + p["be1"]
    h = jnp.maximum(h, 0.0)
    h = h @ p["w2"] + p["b2"]
    h = (h - p["rm2"]) / jnp.sqrt(p["rv2"] + BN_EPS) * p["g2"] + p["be2"]
    h = jnp.maximum(h, 0.0)
    return h @ p["w3"] + p["b3"]


def _reference_folded(x, kp):
    """Pure-JAX forward with the same bf16 folded weights the kernel uses."""
    f = x.reshape(x.shape[0], -1).astype(jnp.bfloat16)
    bias = kp["bias"]
    b1 = bias[0:1, :H1]
    b2 = bias[1:2, :H2]
    b3 = bias[2:3, :OUT_PAD]
    h = jnp.dot(f, kp["w1"], preferred_element_type=jnp.float32) + b1
    h = jnp.maximum(h, 0.0)
    h = jnp.dot(h.astype(jnp.bfloat16), kp["w2"], preferred_element_type=jnp.float32) + b2
    h = jnp.maximum(h, 0.0)
    out = jnp.dot(h.astype(jnp.bfloat16), kp["w3"], preferred_element_type=jnp.float32) + b3
    return out[:, :OUT_DIM]


if __name__ == "__main__":
    key = jax.random.PRNGKey(0)
    k_x, k_p = jax.random.split(key)

    # Small NCHW input: batch=2, channels=4, spatial=16x16  => input_dim = 1024
    B, C, H, W = 2, 4, 16, 16
    x = jax.random.normal(k_x, (B, C, H, W), jnp.float32)
    params = make_params(k_p, C * H * W)
    kparams = prepare_kernel_params(params)

    out = jax.block_until_ready(fine_tune_model_forward(x, kparams))
    assert out.shape == (B, OUT_DIM) and out.dtype == jnp.float32

    # Tight check: kernel math vs identical bf16-folded pure-JAX forward.
    ref_folded = _reference_folded(x, kparams)
    assert jnp.allclose(out, ref_folded, atol=1e-3, rtol=1e-3), \
        "mismatch vs bf16-folded reference"

    # Loose check: semantics vs exact f32 unfolded (PyTorch-equivalent) forward;
    # slack only accounts for bf16 weight/activation rounding.
    ref_exact = _reference_exact(x, params)
    assert jnp.allclose(out, ref_exact, atol=5e-2, rtol=5e-2), \
        "mismatch vs exact f32 reference"

    print("KERNEL_OK")
</pallas_src>

<mosaic_0001>
module attributes {stable_mosaic.version = 11 : i64} {
  func.func @_head_kernel(%arg0: i32, %arg1: memref<16x1024xbf16, #tpu.memory_space<vmem>>, %arg2: memref<1024x256xbf16, #tpu.memory_space<vmem>>, %arg3: memref<256x128xbf16, #tpu.memory_space<vmem>>, %arg4: memref<128x128xbf16, #tpu.memory_space<vmem>>, %arg5: memref<8x256xf32, #tpu.memory_space<vmem>>, %arg6: memref<16x128xf32, #tpu.memory_space<vmem>>) attributes {dimension_semantics = [#tpu.dimension_semantics<parallel>], iteration_bounds = array<i64: 1>, scalar_prefetch = 0 : i64, scratch_operands = 0 : i64, tpu.core_type = #tpu.core_type<tc>, window_params = [{transform_indices = @transform_0, window_bounds = array<i64: 16, 1024>}, {pipeline_mode = #tpu.pipeline_mode<synchronous>, transform_indices = @transform_1, window_bounds = array<i64: 1024, 256>}, {pipeline_mode = #tpu.pipeline_mode<synchronous>, transform_indices = @transform_2, window_bounds = array<i64: 256, 128>}, {pipeline_mode = #tpu.pipeline_mode<synchronous>, transform_indices = @transform_3, window_bounds = array<i64: 128, 128>}, {pipeline_mode = #tpu.pipeline_mode<synchronous>, transform_indices = @transform_4, window_bounds = array<i64: 8, 256>}, {transform_indices = @transform_5, window_bounds = array<i64: 16, 128>}]} {
    %c0 = arith.constant 0 : index
    %c0_0 = arith.constant 0 : index
    %0 = vector.load %arg1[%c0, %c0_0] : memref<16x1024xbf16, #tpu.memory_space<vmem>>, vector<16x1024xbf16>
    %c0_1 = arith.constant 0 : index
    %c0_2 = arith.constant 0 : index
    %1 = vector.load %arg5[%c0_1, %c0_2] : memref<8x256xf32, #tpu.memory_space<vmem>>, vector<8x256xf32>
    %2 = vector.extract_strided_slice %1 {offsets = [0, 0], sizes = [1, 256], strides = [1, 1]} : vector<8x256xf32> to vector<1x256xf32>
    %3 = vector.extract_strided_slice %1 {offsets = [1, 0], sizes = [1, 128], strides = [1, 1]} : vector<8x256xf32> to vector<1x128xf32>
    %4 = vector.extract_strided_slice %1 {offsets = [2, 0], sizes = [1, 128], strides = [1, 1]} : vector<8x256xf32> to vector<1x128xf32>
    %c0_3 = arith.constant 0 : index
    %c0_4 = arith.constant 0 : index
    %5 = vector.load %arg2[%c0_3, %c0_4] : memref<1024x256xbf16, #tpu.memory_space<vmem>>, vector<1024x256xbf16>
    %cst = arith.constant dense<0.000000e+00> : vector<16x256xf32>
    %6 = tpu.matmul %0, %5, %cst {dimension_numbers = #tpu.dot_dimension_numbers<[1], [0], [0], [1], [0, 0, 1, 1], [], []>} : vector<16x1024xbf16>, vector<1024x256xbf16>, vector<16x256xf32> -> vector<16x256xf32>
    %7 = vector.broadcast %2 : vector<1x256xf32> to vector<16x256xf32>
    %8 = arith.addf %6, %7 : vector<16x256xf32>
    %cst_5 = arith.constant 0.000000e+00 : f32
    %9 = vector.broadcast %cst_5 : f32 to vector<16x256xf32>
    %10 = arith.maximumf %8, %9 : vector<16x256xf32>
    %11 = arith.truncf %10 : vector<16x256xf32> to vector<16x256xbf16>
    %c0_6 = arith.constant 0 : index
    %c0_7 = arith.constant 0 : index
    %12 = vector.load %arg3[%c0_6, %c0_7] : memref<256x128xbf16, #tpu.memory_space<vmem>>, vector<256x128xbf16>
    %cst_8 = arith.constant dense<0.000000e+00> : vector<16x128xf32>
    %13 = tpu.matmul %11, %12, %cst_8 {dimension_numbers = #tpu.dot_dimension_numbers<[1], [0], [0], [1], [0, 0, 1, 1], [], []>} : vector<16x256xbf16>, vector<256x128xbf16>, vector<16x128xf32> -> vector<16x128xf32>
    %14 = vector.broadcast %3 : vector<1x128xf32> to vector<16x128xf32>
    %15 = arith.addf %13, %14 : vector<16x128xf32>
    %cst_9 = arith.constant 0.000000e+00 : f32
    %16 = vector.broadcast %cst_9 : f32 to vector<16x128xf32>
    %17 = arith.maximumf %15, %16 : vector<16x128xf32>
    %18 = arith.truncf %17 : vector<16x128xf32> to vector<16x128xbf16>
    %c0_10 = arith.constant 0 : index
    %c0_11 = arith.constant 0 : index
    %19 = vector.load %arg4[%c0_10, %c0_11] : memref<128x128xbf16, #tpu.memory_space<vmem>>, vector<128x128xbf16>
    %cst_12 = arith.constant dense<0.000000e+00> : vector<16x128xf32>
    %20 = tpu.matmul %18, %19, %cst_12 {dimension_numbers = #tpu.dot_dimension_numbers<[1], [0], [0], [1], [0, 0, 1, 1], [], []>} : vector<16x128xbf16>, vector<128x128xbf16>, vector<16x128xf32> -> vector<16x128xf32>
    %21 = vector.broadcast %4 : vector<1x128xf32> to vector<16x128xf32>
    %22 = arith.addf %20, %21 : vector<16x128xf32>
    %c0_13 = arith.constant 0 : index
    %c0_14 = arith.constant 0 : index
    %23 = vector.load %arg6[%c0_13, %c0_14] : memref<16x128xf32, #tpu.memory_space<vmem>>, vector<16x128xf32>
    tpu.vector_store %arg6[%c0_13, %c0_14], %22 {strides = array<i32>} : memref<16x128xf32, #tpu.memory_space<vmem>>, vector<16x128xf32>,
    return
  }
  func.func @transform_0(%arg0: i32) -> (i32, i32) {
    %c0_i32 = arith.constant 0 : i32
    %c0_i32_0 = arith.constant 0 : i32
    return %arg0, %c0_i32 : i32, i32
  }
  func.func @transform_1(%arg0: i32) -> (i32, i32) {
    %c0_i32 = arith.constant 0 : i32
    %c0_i32_0 = arith.constant 0 : i32
    %c0_i32_1 = arith.constant 0 : i32
    return %c0_i32, %c0_i32_0 : i32, i32
  }
  func.func @transform_2(%arg0: i32) -> (i32, i32) {
    %c0_i32 = arith.constant 0 : i32
    %c0_i32_0 = arith.constant 0 : i32
    %c0_i32_1 = arith.constant 0 : i32
    return %c0_i32, %c0_i32_0 : i32, i32
  }
  func.func @transform_3(%arg0: i32) -> (i32, i32) {
    %c0_i32 = arith.constant 0 : i32
    %c0_i32_0 = arith.constant 0 : i32
    %c0_i32_1 = arith.constant 0 : i32
    return %c0_i32, %c0_i32_0 : i32, i32
  }
  func.func @transform_4(%arg0: i32) -> (i32, i32) {
    %c0_i32 = arith.constant 0 : i32
    %c0_i32_0 = arith.constant 0 : i32
    %c0_i32_1 = arith.constant 0 : i32
    return %c0_i32, %c0_i32_0 : i32, i32
  }
  func.func @transform_5(%arg0: i32) -> (i32, i32) {
    %c0_i32 = arith.constant 0 : i32
    %c0_i32_0 = arith.constant 0 : i32
    return %arg0, %c0_i32 : i32, i32
  }
}

</mosaic_0001>

<bundles_post_ra>
// kernel: tpu_custom_call.1
= control target key start
LH: loop header
LB: loop body
LE: loop exit
PB: predicated region body
PF: predicated region fallthrough
CT: control target
= control target key end

     0   :  { %10 = vsyncpa [#allocation3], 0  ;;  %s2157_s0 = inlined_call_operand.hbm [shape: bf16[16,1024], index: 0, kind: input, shape index: {}]   ;;  %s2158_s1 = inlined_call_operand.hbm [shape: bf16[1024,256], index: 1, kind: input, shape index: {}]   ;;  %s2159_s2 = inlined_call_operand.hbm [shape: bf16[256,128], index: 2, kind: input, shape index: {}]   ;;  %s2160_s3 = inlined_call_operand.hbm [shape: bf16[128,128], index: 3, kind: input, shape index: {}]   ;;  %s2161_s4 = inlined_call_operand.hbm [shape: f32[8,256], index: 4, kind: input, shape index: {}]   ;;  %s2162_s5 = inlined_call_operand.hbm [shape: f32[16,128], index: 5, kind: output, shape index: {}]  }
   0x1   :  { %11 = vsyncpa [#allocation6], 0 }
   0x2   :  { %12 = vsyncpa [#allocation9], 0 }
   0x3   :  { %13 = vsyncpa [#allocation4], 0  ;;  %s1995_s18 = smov [#allocation5]   ;;  %s1855_s22 = scalar_lea.hbm %s2158_s1, 16384 }
   0x4   :  { %s31_s19 = sshll.u32 %s1995_s18, 4  ;;  %p1856_p0 = scmp.ne.s32.totalorder %s2158_s1, %s1855_s22  ;;  %s32_s19 = int_to_ptr.vmem [resolvable:$true] %s31_s19 }
   0x5   :  { %p1859_p1 = scmp.lt.u32.totalorder %s1855_s22, %s2158_s1 }
   0x7   :  { %p1861_p2 = pnand %p1859_p1, %p1856_p0 }
   0x9   :  { %1864 = shalt.err (!%p1861_p2)
}
   0xa   :  { %s1865_s27 = scalar_lea.vmem %s32_s19, 16384  ;;  %p1870_p4 = scmp.lt.s32.totalorder %s32_s19, %s32_s19 }
   0xb   :  { %p1866_p3 = scmp.ne.s32.totalorder %s32_s19, %s1865_s27  ;;  %p1871_p5 = scmp.lt.s32.totalorder %s1865_s27, %s1865_s27 }
   0xd   :  { %p1872_p6 = por %p1871_p5, %p1870_p4 }
   0xf   :  { %p1873_p7 = pnand %p1872_p6, %p1866_p3 }
  0x11   :  { %1876 = shalt.err (!%p1873_p7)
}
  0x12   :  { %s1996_s28 = smov 128   ;;  %s1997_s29 = smov 8  }
  0x13   :  { %37 = dma.hbm_to_vmem [thread:$0]  %s2158_s1, 16384, %s32_s19, [#allocation6], %s1996_s28, %s1996_s28, %s1997_s29  }
  0x14   :  { %s1998_s7 = smov [#allocation8]   ;;  %s1999_s9 = smov [#allocation2]  }
  0x15   :  { %s55_s8 = sshll.u32 %s1998_s7, 4  ;;  %s19_s10 = sshll.u32 %s1999_s9, 4  ;;  %s56_s8 = int_to_ptr.vmem [resolvable:$true] %s55_s8  ;;  %s20_s10 = int_to_ptr.vmem [resolvable:$true] %s19_s10 }
  0x16   :  { %s1877_s13 = scalar_lea.hbm %s2160_s3, 1024 }
  0x17   :  { %p1878_p8 = scmp.ne.s32.totalorder %s2160_s3, %s1877_s13  ;;  %p1881_p9 = scmp.lt.u32.totalorder %s1877_s13, %s2160_s3 }
  0x19   :  { %p1883_p10 = pnand %p1881_p9, %p1878_p8 }
  0x1b   :  { %1886 = shalt.err (!%p1883_p10)
}
  0x1c   :  { %s1887_s1 = scalar_lea.vmem %s56_s8, 1024  ;;  %p1892_p12 = scmp.lt.s32.totalorder %s56_s8, %s56_s8 }
  0x1d   :  { %p1888_p11 = scmp.ne.s32.totalorder %s56_s8, %s1887_s1  ;;  %p1893_p13 = scmp.lt.s32.totalorder %s1887_s1, %s1887_s1 }
  0x1f   :  { %p1894_p0 = por %p1893_p13, %p1892_p12 }
  0x21   :  { %p1895_p1 = pnand %p1894_p0, %p1888_p11 }
  0x23   :  { %1898 = shalt.err (!%p1895_p1)
}
  0x24   :  { %s2000_s18 = smov 64   ;;  %s2001_s19 = smov 4  }
  0x25   :  { %61 = dma.hbm_to_vmem [thread:$0]  %s2160_s3, 1024, %s56_s8, [#allocation9], %s2000_s18, %s2000_s18, %s2001_s19  }
  0x26   :  { %s1899_s24 = scalar_lea.hbm %s2157_s0, 1024 }
  0x27   :  { %p1900_p2 = scmp.ne.s32.totalorder %s2157_s0, %s1899_s24  ;;  %p1903_p3 = scmp.lt.u32.totalorder %s1899_s24, %s2157_s0 }
  0x29   :  { %p1905_p4 = pnand %p1903_p3, %p1900_p2 }
  0x2b   :  { %1908 = shalt.err (!%p1905_p4)
}
  0x2c   :  { %s1909_s6 = scalar_lea.vmem %s20_s10, 1024  ;;  %p1914_p6 = scmp.lt.s32.totalorder %s20_s10, %s20_s10 }
  0x2d   :  { %p1910_p5 = scmp.ne.s32.totalorder %s20_s10, %s1909_s6  ;;  %p1915_p7 = scmp.lt.s32.totalorder %s1909_s6, %s1909_s6 }
  0x2f   :  { %p1916_p8 = por %p1915_p7, %p1914_p6 }
  0x31   :  { %p1917_p9 = pnand %p1916_p8, %p1910_p5 }
  0x33   :  { %1920 = shalt.err (!%p1917_p9)
}
  0x34   :  { %s2002_s3 = smov 512   ;;  %s2003_s7 = smov 32  }
  0x35   :  { %25 = dma.hbm_to_vmem [thread:$0]  %s2157_s0, 1024, %s20_s10, [#allocation3], %s2002_s3, %s2002_s3, %s2003_s7  }
  0x36   :  { %s2004_s11 = smov [#allocation7]   ;;  %s2005_s13 = smov [#allocation10]  }
  0x37   :  { %s43_s12 = sshll.u32 %s2004_s11, 4  ;;  %s68_s14 = sshll.u32 %s2005_s13, 4  ;;  %s44_s12 = int_to_ptr.vmem [resolvable:$true] %s43_s12  ;;  %s69_s14 = int_to_ptr.vmem [resolvable:$true] %s68_s14 }
  0x38   :  { %s1921_s17 = scalar_lea.hbm %s2159_s2, 2048 }
  0x39   :  { %p1922_p10 = scmp.ne.s32.totalorder %s2159_s2, %s1921_s17  ;;  %p1925_p11 = scmp.lt.u32.totalorder %s1921_s17, %s2159_s2 }
  0x3b   :  { %p1927_p12 = pnand %p1925_p11, %p1922_p10 }
  0x3d   :  { %1930 = shalt.err (!%p1927_p12)
}
  0x3e   :  { %s1931_s0 = scalar_lea.vmem %s44_s12, 2048  ;;  %p1936_p0 = scmp.lt.s32.totalorder %s44_s12, %s44_s12 }
  0x3f   :  { %p1932_p13 = scmp.ne.s32.totalorder %s44_s12, %s1931_s0  ;;  %p1937_p1 = scmp.lt.s32.totalorder %s1931_s0, %s1931_s0 }
  0x41   :  { %p1938_p2 = por %p1937_p1, %p1936_p0 }
  0x43   :  { %p1939_p3 = pnand %p1938_p2, %p1932_p13 }
  0x45   :  { %1942 = shalt.err (!%p1939_p3)
}
  0x46   :  { %49 = dma.hbm_to_vmem [thread:$0]  %s2159_s2, 2048, %s44_s12, [#allocation6], %s2000_s18, %s2000_s18, %s2001_s19  }
  0x47   :  { %s1943_s26 = scalar_lea.hbm %s2161_s4, 256 }
  0x48   :  { %p1944_p4 = scmp.ne.s32.totalorder %s2161_s4, %s1943_s26  ;;  %p1947_p5 = scmp.lt.u32.totalorder %s1943_s26, %s2161_s4 }
  0x4a   :  { %p1949_p6 = pnand %p1947_p5, %p1944_p4 }
  0x4c   :  { %1952 = shalt.err (!%p1949_p6)
}
  0x4d   :  { %s1953_s7 = scalar_lea.vmem %s69_s14, 256  ;;  %p1958_p8 = scmp.lt.s32.totalorder %s69_s14, %s69_s14 }
  0x4e   :  { %p1954_p7 = scmp.ne.s32.totalorder %s69_s14, %s1953_s7  ;;  %p1959_p9 = scmp.lt.s32.totalorder %s1953_s7, %s1953_s7 }
  0x50   :  { %p1960_p10 = por %p1959_p9, %p1958_p8 }
  0x52   :  { %p1961_p11 = pnand %p1960_p10, %p1954_p7 }
  0x54   :  { %1964 = shalt.err (!%p1961_p11)
}
  0x55   :  { %71 = dma.hbm_to_vmem [thread:$0]  %s2161_s4, 256, %s69_s14, [#allocation9]  }
  0x56   :  { %1987 = dma.done.wait [#allocation3], 1024  }
  0x57   :  { %1988 = vsyncadd [#allocation3], 4294966272 }
  0x58   :  { %1989 = dma.done.wait [#allocation6], 18432  }
  0x59   :  { %1990 = vsyncadd [#allocation6], 4294948864 }
  0x5a   :  { %1991 = dma.done.wait [#allocation9], 1280  }
  0x5b   :  { %1992 = vsyncadd [#allocation9], 4294966016  ;;  %v1639_v0 = vld [vmem:[#allocation5 + $0x104] ss:$8 sps:$4 sm:$0xff]   ;;  %v1641_v1 = vld [vmem:[#allocation5 + $0x100] ss:$8 sps:$4 sm:$0xff]  }
  0x5c   :  { %957 = vmatprep.subr.bf16.mxu0 %v1639_v0  ;;  %v1642_v2 = vld [vmem:[#allocation5 + $0x114] ss:$8 sps:$4 sm:$0xff]   ;;  %v1644_v3 = vld [vmem:[#allocation5 + $0x110] ss:$8 sps:$4 sm:$0xff]   ;;  %v1645_v4 = vld [vmem:[#allocation5 + $0x124] ss:$8 sps:$4 sm:$0xff]  }
  0x5d   :  { %958 = vmatpush1.bf16.msra.mxu0 %v1641_v1  ;;  %v1647_v5 = vld [vmem:[#allocation5 + $0x120] ss:$8 sps:$4 sm:$0xff]   ;;  %v1648_v6 = vld [vmem:[#allocation5 + $0x134] ss:$8 sps:$4 sm:$0xff]   ;;  %v1650_v7 = vld [vmem:[#allocation5 + $0x130] ss:$8 sps:$4 sm:$0xff]  }
  0x5e   :  { %959 = vmatprep.subr.bf16.mxu0 %v1642_v2  ;;  %v1651_v8 = vld [vmem:[#allocation5 + $0x144] ss:$8 sps:$4 sm:$0xff]   ;;  %v1653_v9 = vld [vmem:[#allocation5 + $0x140] ss:$8 sps:$4 sm:$0xff]   ;;  %v1654_v10 = vld [vmem:[#allocation5 + $0x154] ss:$8 sps:$4 sm:$0xff]  }
  0x5f   :  { %v1656_v11 = vld [vmem:[#allocation5 + $0x150] ss:$8 sps:$4 sm:$0xff]   ;;  %v1657_v12 = vld [vmem:[#allocation5 + $0x164] ss:$8 sps:$4 sm:$0xff]   ;;  %v1659_v16 = vld [vmem:[#allocation5 + $0x160] ss:$8 sps:$4 sm:$0xff]  }
  0x60   :  { %v2108_v13 = vld [vmem:[#allocation2 + $0x8] sm:$0xff]  ;;  %v1660_v17 = vld [vmem:[#allocation5 + $0x174] ss:$8 sps:$4 sm:$0xff]   ;;  %v1662_v18 = vld [vmem:[#allocation5 + $0x170] ss:$8 sps:$4 sm:$0xff]   ;;  %vm2007_vm0 = vmmov 0  }
  0x61   :  { %960 = vmatpush1.bf16.msra.mxu0 %v1644_v3  ;;  %v2110_v14 = vld [vmem:[#allocation2 + $0x28] sm:$0xff]  ;;  %v1666_v21 = vld [vmem:[#allocation5 + $0x194] ss:$8 sps:$4 sm:$0xff]   ;;  %v1668_v22 = vld [vmem:[#allocation5 + $0x190] ss:$8 sps:$4 sm:$0xff]   ;;  %s2008_s4 = smov [#allocation11]  }
  0x62   :  { %961 = vmatprep.subr.bf16.mxu0 %v1645_v4  ;;  %v1401_v15 = vcombine.high %v2108_v13, %v2110_v14  ;;  %v1663_v19 = vld [vmem:[#allocation5 + $0x184] ss:$8 sps:$4 sm:$0xff]   ;;  %v1665_v20 = vld [vmem:[#allocation5 + $0x180] ss:$8 sps:$4 sm:$0xff]   ;;  %v1672_v25 = vld [vmem:[#allocation5 + $0x1b4] ss:$8 sps:$4 sm:$0xff]   ;;  %v1400_v50 = vcombine.low %v2108_v13, %v2110_v14 }
  0x63   :  { %v1669_v23 = vld [vmem:[#allocation5 + $0x1a4] ss:$8 sps:$4 sm:$0xff]   ;;  %v1671_v24 = vld [vmem:[#allocation5 + $0x1a0] ss:$8 sps:$4 sm:$0xff]   ;;  %v1674_v26 = vld [vmem:[#allocation5 + $0x1b0] ss:$8 sps:$4 sm:$0xff]  }
  0x64   :  { %989 = vmatprep.mubr.bf16.mxu0 %v1401_v15  ;;  %v1732_v27 = vld [vmem:[#allocation5 + $0x4] ss:$8 sps:$4 sm:$0xff]   ;;  %v1734_v28 = vld [vmem:[#allocation5] ss:$8 sps:$4 sm:$0xff]   ;;  %v1738_v30 = vld [vmem:[#allocation5 + $0x14] ss:$8 sps:$4 sm:$0xff]  }
  0x65   :  { %962 = vmatpush1.bf16.msra.mxu0 %v1647_v5  ;;  %v1675_v29 = vld [vmem:[#allocation5 + $0x1c4] ss:$8 sps:$4 sm:$0xff]   ;;  %914 = vmatprep.subr.bf16.mxu1 %v1732_v27  ;;  %v1740_v31 = vld [vmem:[#allocation5 + $0x10] ss:$8 sps:$4 sm:$0xff]   ;;  %v1677_v32 = vld [vmem:[#allocation5 + $0x1c0] ss:$8 sps:$4 sm:$0xff]  }
  0x66   :  { %963 = vmatprep.subr.bf16.mxu0 %v1648_v6  ;;  %915 = vmatpush1.bf16.msra.mxu1 %v1734_v28  ;;  %v1678_v33 = vld [vmem:[#allocation5 + $0x1d4] ss:$8 sps:$4 sm:$0xff]   ;;  %v1744_v34 = vld [vmem:[#allocation5 + $0x24] ss:$8 sps:$4 sm:$0xff]   ;;  %v1746_v35 = vld [vmem:[#allocation5 + $0x20] ss:$8 sps:$4 sm:$0xff]  }
  0x67   :  { %916 = vmatprep.subr.bf16.mxu1 %v1738_v30  ;;  %v1680_v36 = vld [vmem:[#allocation5 + $0x1d0] ss:$8 sps:$4 sm:$0xff]   ;;  %v1750_v37 = vld [vmem:[#allocation5 + $0x34] ss:$8 sps:$4 sm:$0xff]   ;;  %v1681_v38 = vld [vmem:[#allocation5 + $0x1e4] ss:$8 sps:$4 sm:$0xff]  }
  0x68   :  { %v1752_v39 = vld [vmem:[#allocation5 + $0x30] ss:$8 sps:$4 sm:$0xff]   ;;  %v1756_v40 = vld [vmem:[#allocation5 + $0x44] ss:$8 sps:$4 sm:$0xff]   ;;  %v1683_v41 = vld [vmem:[#allocation5 + $0x1e0] ss:$8 sps:$4 sm:$0xff]  }
  0x69   :  { %964 = vmatpush1.bf16.msra.mxu0 %v1650_v7  ;;  %v1684_v42 = vld [vmem:[#allocation5 + $0x1f4] ss:$8 sps:$4 sm:$0xff]   ;;  %v1758_v43 = vld [vmem:[#allocation5 + $0x40] ss:$8 sps:$4 sm:$0xff]   ;;  %v1686_v44 = vld [vmem:[#allocation5 + $0x1f0] ss:$8 sps:$4 sm:$0xff]  }
  0x6a   :  { %965 = vmatprep.subr.bf16.mxu0 %v1651_v8  ;;  %917 = vmatpush1.bf16.msra.mxu1 %v1740_v31  ;;  %v1762_v45 = vld [vmem:[#allocation5 + $0x54] ss:$8 sps:$4 sm:$0xff]   ;;  %v1689_v46 = vld [vmem:[#allocation5 + $0x204] ss:$8 sps:$4 sm:$0xff]   ;;  %v1764_v49 = vld [vmem:[#allocation5 + $0x50] ss:$8 sps:$4 sm:$0xff]  }
  0x6b   :  { %918 = vmatprep.subr.bf16.mxu1 %v1744_v34  ;;  %v2114_v47 = vld [vmem:[#allocation2 + $0x10] sm:$0xff]  ;;  %v1768_v51 = vld [vmem:[#allocation5 + $0x64] ss:$8 sps:$4 sm:$0xff]   ;;  %v1687_v52 = vld [vmem:[#allocation5 + $0x200] ss:$8 sps:$4 sm:$0xff]   ;;  %s1384_s19 = sshll.u32 %s2008_s4, 4  ;;  %s1385_s19 = int_to_ptr.vmem [resolvable:$true] %s1384_s19 }
  0x6c   :  { %v2116_v48 = vld [vmem:[#allocation2 + $0x30] sm:$0xff]  ;;  %v1770_v55 = vld [vmem:[#allocation5 + $0x60] ss:$8 sps:$4 sm:$0xff]   ;;  %v1695_v58 = vld [vmem:[#allocation5 + $0x224] ss:$8 sps:$4 sm:$0xff]   ;;  %s1965_s8 = scalar_lea.vmem %s1385_s19, 256  ;;  %p1970_p13 = scmp.lt.s32.totalorder %s1385_s19, %s1385_s19 }
  0x6d   :  { %966 = vmatpush1.bf16.msra.mxu0 %v1653_v9  ;;  %v1403_v53 = vcombine.high %v2114_v47, %v2116_v48  ;;  %v1692_v54 = vld [vmem:[#allocation5 + $0x214] ss:$8 sps:$4 sm:$0xff]   ;;  %v1690_v57 = vld [vmem:[#allocation5 + $0x210] ss:$8 sps:$4 sm:$0xff]   ;;  %v1780_v60 = vld [vmem:[#allocation5 + $0x84] ss:$8 sps:$4 sm:$0xff]   ;;  %p1966_p12 = scmp.ne.s32.totalorder %s1385_s19, %s1965_s8  ;;  %p1971_p0 = scmp.lt.s32.totalorder %s1965_s8, %s1965_s8 }
  0x6e   :  { %967 = vmatprep.subr.bf16.mxu0 %v1654_v10  ;;  %919 = vmatpush1.bf16.msra.mxu1 %v1746_v35  ;;  %v1774_v56 = vld [vmem:[#allocation5 + $0x74] ss:$8 sps:$4 sm:$0xff]   ;;  %v1776_v59 = vld [vmem:[#allocation5 + $0x70] ss:$8 sps:$4 sm:$0xff]   ;;  %v1693_v61 = vld [vmem:[#allocation5 + $0x220] ss:$8 sps:$4 sm:$0xff]  }
  0x6f   :  { %920 = vmatprep.subr.bf16.mxu1 %v1750_v37  ;;  %v1698_v62 = vld [vmem:[#allocation5 + $0x234] ss:$8 sps:$4 sm:$0xff]   ;;  %v1782_v63 = vld [vmem:[#allocation5 + $0x80] ss:$8 sps:$4 sm:$0xff]   ;;  %v1696_v1 = vld [vmem:[#allocation5 + $0x230] ss:$8 sps:$4 sm:$0xff]   ;;  %p1972_p1 = por %p1971_p0, %p1970_p13 }
  0x70   :  { %v1786_v0 = vld [vmem:[#allocation5 + $0x94] ss:$8 sps:$4 sm:$0xff]   ;;  %v1701_v2 = vld [vmem:[#allocation5 + $0x244] ss:$8 sps:$4 sm:$0xff]   ;;  %v1788_v3 = vld [vmem:[#allocation5 + $0x90] ss:$8 sps:$4 sm:$0xff]  }
  0x71   :  { %968 = vmatpush1.bf16.msra.mxu0 %v1656_v11  ;;  %v1792_v4 = vld [vmem:[#allocation5 + $0xa4] ss:$8 sps:$4 sm:$0xff]   ;;  %v1699_v5 = vld [vmem:[#allocation5 + $0x240] ss:$8 sps:$4 sm:$0xff]   ;;  %v1704_v6 = vld [vmem:[#allocation5 + $0x254] ss:$8 sps:$4 sm:$0xff]   ;;  %p1973_p2 = pnand %p1972_p1, %p1966_p12 }
  0x72   :  { %969 = vmatprep.subr.bf16.mxu0 %v1657_v12  ;;  %921 = vmatpush1.bf16.msra.mxu1 %v1752_v39  ;;  %v1794_v7 = vld [vmem:[#allocation5 + $0xa0] ss:$8 sps:$4 sm:$0xff]   ;;  %v1798_v8 = vld [vmem:[#allocation5 + $0xb4] ss:$8 sps:$4 sm:$0xff]   ;;  %v1702_v9 = vld [vmem:[#allocation5 + $0x250] ss:$8 sps:$4 sm:$0xff]  }
  0x73   :  { %922 = vmatprep.subr.bf16.mxu1 %v1756_v40  ;;  %v1707_v10 = vld [vmem:[#allocation5 + $0x264] ss:$8 sps:$4 sm:$0xff]   ;;  %v1800_v11 = vld [vmem:[#allocation5 + $0xb0] ss:$8 sps:$4 sm:$0xff]   ;;  %v1822_v27 = vld [vmem:[#allocation5 + $0xf4] ss:$8 sps:$4 sm:$0xff]  }
  0x74   :  { %v88_v12 = vld [vmem:[#allocation2] sm:$0xff]  ;;  %v1714_v28 = vld [vmem:[#allocation5 + $0x290] ss:$8 sps:$4 sm:$0xff]   ;;  %v1834_v39 = vld [vmem:[#allocation7 + $0x8] sm:$0xff]  }
  0x75   :  { %970 = vmatpush1.bf16.msra.mxu0 %v1659_v16  ;;  %v92_v13 = vld [vmem:[#allocation2 + $0x20] sm:$0xff]  ;;  %v1824_v30 = vld [vmem:[#allocation5 + $0xf0] ss:$8 sps:$4 sm:$0xff]  }
  0x76   :  { %971 = vmatprep.subr.bf16.mxu0 %v1660_v17  ;;  %923 = vmatpush1.bf16.msra.mxu1 %v1758_v43  ;;  %v1804_v14 = vld [vmem:[#allocation5 + $0xc4] ss:$8 sps:$4 sm:$0xff]   ;;  %v1399_v15 = vcombine.high %v88_v12, %v92_v13  ;;  %v1705_v16 = vld [vmem:[#allocation5 + $0x260] ss:$8 sps:$4 sm:$0xff]   ;;  %v1710_v17 = vld [vmem:[#allocation5 + $0x274] ss:$8 sps:$4 sm:$0xff]   ;;  %v1398_v35 = vcombine.low %v88_v12, %v92_v13 }
  0x77   :  { %924 = vmatprep.subr.bf16.mxu1 %v1762_v45  ;;  %v1831_v31 = vld [vmem:[#allocation7 + $0x40] sm:$0xff]   ;;  %v1720_v37 = vld [vmem:[#allocation5 + $0x2b0] ss:$8 sps:$4 sm:$0xff]   ;;  %v1809_v13 = vld [vmem:[#allocation5 + $0x3b4] ss:$8 sps:$4 sm:$0xff]  }
  0x78   :  { %946 = vmatprep.mubr.bf16.mxu1 %v1399_v15  ;;  %v1832_v34 = vld [vmem:[#allocation7] sm:$0xff]   ;;  %v1835_v40 = vld [vmem:[#allocation7 + $0x50] sm:$0xff]  }
  0x79   :  { %972 = vmatpush1.bf16.msra.mxu0 %v1662_v18  ;;  %v1806_v18 = vld [vmem:[#allocation5 + $0xc0] ss:$8 sps:$4 sm:$0xff]   ;;  %v1836_v43 = vld [vmem:[#allocation7 + $0x10] sm:$0xff]   ;;  %v1815_v15 = vld [vmem:[#allocation5 + $0x3c4] ss:$8 sps:$4 sm:$0xff]  }
  0x7a   :  { %973 = vmatprep.subr.bf16.mxu0 %v1663_v19  ;;  %925 = vmatpush1.bf16.msra.mxu1 %v1764_v49  ;;  %v1810_v19 = vld [vmem:[#allocation5 + $0xd4] ss:$8 sps:$4 sm:$0xff]   ;;  %v1726_v45 = vld [vmem:[#allocation5 + $0x2d0] ss:$8 sps:$4 sm:$0xff]   ;;  %v1801_v12 = vld [vmem:[#allocation5 + $0x3a0] ss:$8 sps:$4 sm:$0xff]  }
  0x7b   :  { %926 = vmatprep.subr.bf16.mxu1 %v1768_v51  ;;  %v1838_v49 = vld [vmem:[#allocation7 + $0x18] sm:$0xff]  }
  0x7c   :  { %v1737_v51 = vld [vmem:[#allocation5 + $0x2f4] ss:$8 sps:$4 sm:$0xff]  }
  0x7d   :  { %974 = vmatpush1.bf16.msra.mxu0 %v1665_v20  ;;  %v1708_v20 = vld [vmem:[#allocation5 + $0x270] ss:$8 sps:$4 sm:$0xff]  }
  0x7e   :  { %975 = vmatprep.subr.bf16.mxu0 %v1666_v21  ;;  %927 = vmatpush1.bf16.msra.mxu1 %v1770_v55  ;;  %v1713_v21 = vld [vmem:[#allocation5 + $0x284] ss:$8 sps:$4 sm:$0xff]   ;;  %v2124_v55 = vld [vmem:[#allocation2 + $0x38] sm:$0xff] }
  0x7f   :  { %928 = vmatprep.subr.bf16.mxu1 %v1774_v56  ;;  %v1402_v56 = vcombine.low %v2114_v47, %v2116_v48  ;;  %v1767_v47 = vld [vmem:[#allocation5 + $0x344] ss:$8 sps:$4 sm:$0xff]   ;;  %v1765_v48 = vld [vmem:[#allocation5 + $0x340] ss:$8 sps:$4 sm:$0xff]  }
  0x81   :  { %976 = vmatpush1.bf16.msra.mxu0 %v1668_v22  ;;  %v1711_v22 = vld [vmem:[#allocation5 + $0x280] ss:$8 sps:$4 sm:$0xff]  }
  0x82   :  { %977 = vmatprep.subr.bf16.mxu0 %v1669_v23  ;;  %929 = vmatpush1.bf16.msra.mxu1 %v1776_v59  ;;  %v1812_v23 = vld [vmem:[#allocation5 + $0xd0] ss:$8 sps:$4 sm:$0xff]   ;;  %v1749_v59 = vld [vmem:[#allocation5 + $0x314] ss:$8 sps:$4 sm:$0xff]  }
  0x83   :  { %930 = vmatprep.subr.bf16.mxu1 %v1780_v60  ;;  %v1747_v60 = vld [vmem:[#allocation5 + $0x310] ss:$8 sps:$4 sm:$0xff]  }
  0x85   :  { %978 = vmatpush1.bf16.msra.mxu0 %v1671_v24  ;;  %v1716_v24 = vld [vmem:[#allocation5 + $0x294] ss:$8 sps:$4 sm:$0xff]  }
  0x86   :  { %979 = vmatprep.subr.bf16.mxu0 %v1672_v25  ;;  %931 = vmatpush1.bf16.msra.mxu1 %v1782_v63  ;;  %v1816_v25 = vld [vmem:[#allocation5 + $0xe4] ss:$8 sps:$4 sm:$0xff]   ;;  %v1761_v63 = vld [vmem:[#allocation5 + $0x334] ss:$8 sps:$4 sm:$0xff]  }
  0x87   :  { %932 = vmatprep.subr.bf16.mxu1 %v1786_v0  ;;  %v1759_v0 = vld [vmem:[#allocation5 + $0x330] ss:$8 sps:$4 sm:$0xff]  }
  0x89   :  { %980 = vmatpush1.bf16.msra.mxu0 %v1674_v26  ;;  %v1818_v26 = vld [vmem:[#allocation5 + $0xe0] ss:$8 sps:$4 sm:$0xff]  }
  0x8a   :  { %981 = vmatprep.subr.bf16.mxu0 %v1675_v29  ;;  %933 = vmatpush1.bf16.msra.mxu1 %v1788_v3  ;;  %v1719_v29 = vld [vmem:[#allocation5 + $0x2a4] ss:$8 sps:$4 sm:$0xff]  }
  0x8b   :  { %934 = vmatprep.subr.bf16.mxu1 %v1792_v4  ;;  %v1779_v3 = vld [vmem:[#allocation5 + $0x364] ss:$8 sps:$4 sm:$0xff]   ;;  %v1777_v4 = vld [vmem:[#allocation5 + $0x360] ss:$8 sps:$4 sm:$0xff]  }
  0x8d   :  { %982 = vmatpush1.bf16.msra.mxu0 %v1677_v32  ;;  %v1717_v32 = vld [vmem:[#allocation5 + $0x2a0] ss:$8 sps:$4 sm:$0xff]  }
  0x8e   :  { %983 = vmatprep.subr.bf16.mxu0 %v1678_v33  ;;  %935 = vmatpush1.bf16.msra.mxu1 %v1794_v7  ;;  %v1722_v33 = vld [vmem:[#allocation5 + $0x2b4] ss:$8 sps:$4 sm:$0xff]   ;;  %v1791_v7 = vld [vmem:[#allocation5 + $0x384] ss:$8 sps:$4 sm:$0xff]  }
  0x8f   :  { %936 = vmatprep.subr.bf16.mxu1 %v1798_v8  ;;  %v1789_v8 = vld [vmem:[#allocation5 + $0x380] ss:$8 sps:$4 sm:$0xff]  }
  0x91   :  { %984 = vmatpush1.bf16.msra.mxu0 %v1680_v36  ;;  %v1833_v36 = vld [vmem:[#allocation7 + $0x48] sm:$0xff]  }
  0x92   :  { %985 = vmatprep.subr.bf16.mxu0 %v1681_v38  ;;  %937 = vmatpush1.bf16.msra.mxu1 %v1800_v11  ;;  %v1725_v38 = vld [vmem:[#allocation5 + $0x2c4] ss:$8 sps:$4 sm:$0xff]  }
  0x93   :  { %938 = vmatprep.subr.bf16.mxu1 %v1804_v14  ;;  %v1803_v11 = vld [vmem:[#allocation5 + $0x3a4] ss:$8 sps:$4 sm:$0xff]   ;;  %v1807_v14 = vld [vmem:[#allocation5 + $0x3b0] ss:$8 sps:$4 sm:$0xff]  }
  0x95   :  { %986 = vmatpush1.bf16.msra.mxu0 %v1683_v41  ;;  %v1723_v41 = vld [vmem:[#allocation5 + $0x2c0] ss:$8 sps:$4 sm:$0xff]  }
  0x96   :  { %987 = vmatprep.subr.bf16.mxu0 %v1684_v42  ;;  %939 = vmatpush1.bf16.msra.mxu1 %v1806_v18  ;;  %v1728_v42 = vld [vmem:[#allocation5 + $0x2d4] ss:$8 sps:$4 sm:$0xff]   ;;  %v1819_v18 = vld [vmem:[#allocation5 + $0x3d0] ss:$8 sps:$4 sm:$0xff]  }
  0x97   :  { %940 = vmatprep.subr.bf16.mxu1 %v1810_v19  ;;  %v1827_v19 = vld [vmem:[#allocation5 + $0x3e4] ss:$8 sps:$4 sm:$0xff]  }
  0x99   :  { %988 = vmatpush1.bf16.msra.mxu0 %v1686_v44  ;;  %v1837_v44 = vld [vmem:[#allocation7 + $0x58] sm:$0xff]  }
  0x9a   :  { %1000 = vmatprep.subr.bf16.mxu0 %v1689_v46  ;;  %941 = vmatpush1.bf16.msra.mxu1 %v1812_v23  ;;  %v1731_v46 = vld [vmem:[#allocation5 + $0x2e4] ss:$8 sps:$4 sm:$0xff]  }
  0x9b   :  { %942 = vmatprep.subr.bf16.mxu1 %v1816_v25  ;;  %v1840_v25 = vld [vmem:[#allocation7 + $0x20] sm:$0xff]  }
  0x9c   :  { %990 = vmatmul.mubr.bf16.vlgmr.msra.gmra.mrb[0].mxu0 %v1400_v50  ;;  %v1729_v50 = vld [vmem:[#allocation5 + $0x2e0] ss:$8 sps:$4 sm:$0xff]  }
  0x9d   :  { %1001 = vmatpush1.bf16.msra.mxu0 %v1687_v52  ;;  %1032 = vmatprep.mubr.bf16.mxu0 %v1403_v53  ;;  %v1735_v52 = vld [vmem:[#allocation5 + $0x2f0] ss:$8 sps:$4 sm:$0xff]   ;;  %v1743_v53 = vld [vmem:[#allocation5 + $0x304] ss:$8 sps:$4 sm:$0xff]  }
  0x9e   :  { %1002 = vmatprep.subr.bf16.mxu0 %v1692_v54  ;;  %943 = vmatpush1.bf16.msra.mxu1 %v1818_v26  ;;  %v2122_v54 = vld [vmem:[#allocation2 + $0x18] sm:$0xff]  ;;  %v1841_v26 = vld [vmem:[#allocation7 + $0x68] sm:$0xff]  }
  0x9f   :  { %944 = vmatprep.subr.bf16.mxu1 %v1822_v27  ;;  %v1404_v23 = vcombine.low %v2122_v54, %v2124_v55  ;;  %v1842_v27 = vld [vmem:[#allocation7 + $0x28] sm:$0xff]  }
  0xa1   :  { %1003 = vmatpush1.bf16.msra.mxu0 %v1690_v57  ;;  %v1741_v57 = vld [vmem:[#allocation5 + $0x300] ss:$8 sps:$4 sm:$0xff]  }
  0xa2   :  { %1004 = vmatprep.subr.bf16.mxu0 %v1695_v58  ;;  %945 = vmatpush1.bf16.msra.mxu1 %v1824_v30  ;;  %v1405_v58 = vcombine.high %v2122_v54, %v2124_v55  ;;  %v1845_v30 = vld [vmem:[#allocation7 + $0x78] sm:$0xff]  }
  0xa3   :  { %1558 = vmatprep.subr.bf16.mxu1 %v1831_v31  ;;  %v1846_v31 = vld [vmem:[#allocation7 + $0x38] sm:$0xff]  }
  0xa5   :  { %1005 = vmatpush1.bf16.msra.mxu0 %v1693_v61  ;;  %947 = vmatmul.mubr.bf16.vlgmr.msra.gmra.mrb[0].mxu1 %v1398_v35  ;;  %v1755_v61 = vld [vmem:[#allocation5 + $0x324] ss:$8 sps:$4 sm:$0xff]  }
  0xa6   :  { %1006 = vmatprep.subr.bf16.mxu0 %v1698_v62  ;;  %1559 = vmatpush3.bf16.msra.mxu1 %v1832_v34  ;;  %v1753_v62 = vld [vmem:[#allocation5 + $0x320] ss:$8 sps:$4 sm:$0xff]  }
  0xa7   :  { %1560 = vmatprep.subr.bf16.mxu1 %v1833_v36 }
  0xa9   :  { %1007 = vmatpush1.bf16.msra.mxu0 %v1696_v1  ;;  %v1773_v1 = vld [vmem:[#allocation5 + $0x354] ss:$8 sps:$4 sm:$0xff]  }
  0xaa   :  { %1008 = vmatprep.subr.bf16.mxu0 %v1701_v2  ;;  %1561 = vmatpush3.bf16.msra.mxu1 %v1834_v39  ;;  %v1771_v2 = vld [vmem:[#allocation5 + $0x350] ss:$8 sps:$4 sm:$0xff]  }
  0xab   :  { %1562 = vmatprep.subr.bf16.mxu1 %v1835_v40  ;;  %v2135_v40 = vld [vmem:[#allocation10] sm:$0xff] }
  0xad   :  { %1009 = vmatpush1.bf16.msra.mxu0 %v1699_v5  ;;  %v1785_v5 = vld [vmem:[#allocation5 + $0x374] ss:$8 sps:$4 sm:$0xff]  }
  0xae   :  { %1010 = vmatprep.subr.bf16.mxu0 %v1704_v6  ;;  %1563 = vmatpush3.bf16.msra.mxu1 %v1836_v43  ;;  %v1783_v6 = vld [vmem:[#allocation5 + $0x370] ss:$8 sps:$4 sm:$0xff]  }
  0xaf   :  { %1564 = vmatprep.subr.bf16.mxu1 %v1837_v44 }
  0xb1   :  { %1011 = vmatpush1.bf16.msra.mxu0 %v1702_v9  ;;  %v1797_v9 = vld [vmem:[#allocation5 + $0x394] ss:$8 sps:$4 sm:$0xff]  }
  0xb2   :  { %1012 = vmatprep.subr.bf16.mxu0 %v1707_v10  ;;  %1565 = vmatpush3.bf16.msra.mxu1 %v1838_v49  ;;  %v1795_v10 = vld [vmem:[#allocation5 + $0x390] ss:$8 sps:$4 sm:$0xff]  }
  0xb5   :  { %1013 = vmatpush1.bf16.msra.mxu0 %v1705_v16  ;;  %v1813_v16 = vld [vmem:[#allocation5 + $0x3c0] ss:$8 sps:$4 sm:$0xff]  }
  0xb6   :  { %1014 = vmatprep.subr.bf16.mxu0 %v1710_v17  ;;  %v1821_v17 = vld [vmem:[#allocation5 + $0x3d4] ss:$8 sps:$4 sm:$0xff]  }
  0xb9   :  { %1015 = vmatpush1.bf16.msra.mxu0 %v1708_v20  ;;  %v1825_v20 = vld [vmem:[#allocation5 + $0x3e0] ss:$8 sps:$4 sm:$0xff]  }
  0xba   :  { %1016 = vmatprep.subr.bf16.mxu0 %v1713_v21  ;;  %v1830_v21 = vld [vmem:[#allocation5 + $0x3f4] ss:$8 sps:$4 sm:$0xff]  }
  0xbd   :  { %1017 = vmatpush1.bf16.msra.mxu0 %v1711_v22  ;;  %v1828_v22 = vld [vmem:[#allocation5 + $0x3f0] ss:$8 sps:$4 sm:$0xff]  }
  0xbe   :  { %1018 = vmatprep.subr.bf16.mxu0 %v1716_v24  ;;  %v1839_v24 = vld [vmem:[#allocation7 + $0x60] sm:$0xff]  }
  0xbf   :  { %1566 = vmatprep.subr.bf16.mxu1 %v1839_v24 }
  0xc0   :  { %1567 = vmatpush3.bf16.msra.mxu1 %v1840_v25 }
  0xc1   :  { %1019 = vmatpush1.bf16.msra.mxu0 %v1714_v28  ;;  %1568 = vmatprep.subr.bf16.mxu1 %v1841_v26  ;;  %v1843_v28 = vld [vmem:[#allocation7 + $0x70] sm:$0xff]  }
  0xc2   :  { %1020 = vmatprep.subr.bf16.mxu0 %v1719_v29  ;;  %v1844_v29 = vld [vmem:[#allocation7 + $0x30] sm:$0xff]  }
  0xc4   :  { %1569 = vmatpush3.bf16.msra.mxu1 %v1842_v27 }
  0xc5   :  { %1021 = vmatpush1.bf16.msra.mxu0 %v1717_v32  ;;  %1570 = vmatprep.subr.bf16.mxu1 %v1843_v28  ;;  %v2006_v32 = vmov 0.0  }
  0xc6   :  { %1022 = vmatprep.subr.bf16.mxu0 %v1722_v33 }
  0xc8   :  { %1571 = vmatpush3.bf16.msra.mxu1 %v1844_v29 }
  0xc9   :  { %1023 = vmatpush1.bf16.msra.mxu0 %v1720_v37  ;;  %1572 = vmatprep.subr.bf16.mxu1 %v1845_v30  ;;  %v226_v37 = vlaneseq }
  0xca   :  { %1024 = vmatprep.subr.bf16.mxu0 %v1725_v38 }
  0xcb   :  { %v2132_v38 = vshrl.u32 %v226_v37, 7 }
  0xcc   :  { %1573 = vmatpush3.bf16.msra.mxu1 %v1846_v31 }
  0xcd   :  { %1025 = vmatpush1.bf16.msra.mxu0 %v1723_v41  ;;  %1589 = vmatprep.subr.bf16.mxu1 %v2006_v32  ;;  %v228_v39 = vsub.s32 0, %v2132_v38  ;;  %v97_v41 = vld [vmem:[#allocation10 + $0x8] sm:$0xff] }
  0xce   :  { %1026 = vmatprep.subr.bf16.mxu0 %v1728_v42 }
  0xcf   :  { %v229_v42 = vrot.slane %v2135_v40, %v228_v39  ;;  %v233_v43 = vrot.slane %v97_v41, %v228_v39 }
  0xd1   :  { %1027 = vmatpush1.bf16.msra.mxu0 %v1726_v45 }
  0xd2   :  { %1028 = vmatprep.subr.bf16.mxu0 %v1731_v46 }
  0xd5   :  { %1029 = vmatpush1.bf16.msra.mxu0 %v1729_v50 }
  0xd6   :  { %1030 = vmatprep.subr.bf16.mxu0 %v1737_v51 }
  0xd9   :  { %1031 = vmatpush1.bf16.msra.mxu0 %v1735_v52 }
  0xda   :  { %1043 = vmatprep.subr.bf16.mxu0 %v1743_v53 }
  0xdc   :  { %1033 = vmatmul.mubr.bf16.vlgmr.msra.gmra.mrb[0].mxu0 %v1402_v56 }
  0xdd   :  { %1044 = vmatpush1.bf16.msra.mxu0 %v1741_v57  ;;  %1075 = vmatprep.mubr.bf16.mxu0 %v1405_v58 }
  0xde   :  { %1045 = vmatprep.subr.bf16.mxu0 %v1749_v59 }
  0xe1   :  { %1046 = vmatpush1.bf16.msra.mxu0 %v1747_v60 }
  0xe2   :  { %1047 = vmatprep.subr.bf16.mxu0 %v1755_v61 }
  0xe5   :  { %1048 = vmatpush1.bf16.msra.mxu0 %v1753_v62 }
  0xe6   :  { %1049 = vmatprep.subr.bf16.mxu0 %v1761_v63 }
  0xe9   :  { %1050 = vmatpush1.bf16.msra.mxu0 %v1759_v0  ;;  %v1847_v0 = vld [vmem:[#allocation8] sm:$0xff]  }
  0xea   :  { %1051 = vmatprep.subr.bf16.mxu0 %v1767_v47  ;;  %v1848_v47 = vld [vmem:[#allocation8 + $0x8] sm:$0xff]  }
  0xed   :  { %1052 = vmatpush1.bf16.msra.mxu0 %v1765_v48  ;;  %v1849_v48 = vld [vmem:[#allocation8 + $0x10] sm:$0xff]  }
  0xee   :  { %1053 = vmatprep.subr.bf16.mxu0 %v1773_v1  ;;  %v1850_v1 = vld [vmem:[#allocation8 + $0x18] sm:$0xff]  }
  0xf1   :  { %1054 = vmatpush1.bf16.msra.mxu0 %v1771_v2  ;;  %v1851_v2 = vld [vmem:[#allocation8 + $0x20] sm:$0xff]  }
  0xf2   :  { %1055 = vmatprep.subr.bf16.mxu0 %v1779_v3  ;;  %v1852_v3 = vld [vmem:[#allocation8 + $0x28] sm:$0xff]  }
  0xf5   :  { %1056 = vmatpush1.bf16.msra.mxu0 %v1777_v4  ;;  %v1853_v4 = vld [vmem:[#allocation8 + $0x30] sm:$0xff]  }
  0xf6   :  { %1057 = vmatprep.subr.bf16.mxu0 %v1785_v5  ;;  %v1854_v5 = vld [vmem:[#allocation8 + $0x38] sm:$0xff]  }
  0xf9   :  { %1058 = vmatpush1.bf16.msra.mxu0 %v1783_v6  ;;  %v1126_v6 = vsub.s32 1, %v2132_v38 }
  0xfa   :  { %1059 = vmatprep.subr.bf16.mxu0 %v1791_v7 }
  0xfd   :  { %1060 = vmatpush1.bf16.msra.mxu0 %v1789_v8  ;;  %v1127_v8 = vrot.slane %v2135_v40, %v1126_v6 }
  0xfe   :  { %1061 = vmatprep.subr.bf16.mxu0 %v1797_v9 }
 0x101   :  { %1062 = vmatpush1.bf16.msra.mxu0 %v1795_v10 }
 0x102   :  { %1063 = vmatprep.subr.bf16.mxu0 %v1803_v11 }
 0x105   :  { %1064 = vmatpush1.bf16.msra.mxu0 %v1801_v12 }
 0x106   :  { %1065 = vmatprep.subr.bf16.mxu0 %v1809_v13 }
 0x109   :  { %1066 = vmatpush1.bf16.msra.mxu0 %v1807_v14 }
 0x10a   :  { %1067 = vmatprep.subr.bf16.mxu0 %v1815_v15 }
 0x10d   :  { %1068 = vmatpush1.bf16.msra.mxu0 %v1813_v16 }
 0x10e   :  { %1069 = vmatprep.subr.bf16.mxu0 %v1821_v17 }
 0x111   :  { %1070 = vmatpush1.bf16.msra.mxu0 %v1819_v18 }
 0x112   :  { %1071 = vmatprep.subr.bf16.mxu0 %v1827_v19  ;;  %v1286_v19 = vsub.s32 2, %v2132_v38 }
 0x115   :  { %1072 = vmatpush1.bf16.msra.mxu0 %v1825_v20  ;;  %v1287_v20 = vrot.slane %v2135_v40, %v1286_v19 }
 0x116   :  { %1073 = vmatprep.subr.bf16.mxu0 %v1830_v21 }
 0x119   :  { %1074 = vmatpush1.bf16.msra.mxu0 %v1828_v22 }
 0x11c   :  { %1076 = vmatmul.mubr.bf16.vlgmr.msra.gmra.mrb[0].mxu0 %v1404_v23 }
 0x178   :  { %v948_v33 = vpop.f32.mrb[0].mxu1 }
 0x179   :  { %v950_v34 = vpop.f32.mrb[1].mxu1  ;;  %v949_v44 = vadd.f32 %v948_v33, %v229_v42 }
 0x17a   :  { %v952_v35 = vpop.f32.mrb[2].mxu1  ;;  %v951_v45 = vadd.f32 %v950_v34, %v233_v43 }
 0x17b   :  { %v954_v36 = vpop.f32.mrb[3].mxu1  ;;  %v953_v49 = vadd.f32 %v952_v35, %v229_v42 }
 0x17c   :  { %v955_v52 = vadd.f32 %v954_v36, %v233_v43 }
 0x1ef   :  { %v1077_v46 = vpop.f32.mrb[0].mxu0 }
 0x1f0   :  { %v1610_v50 = vadd.f32 %v1077_v46, %v949_v44  ;;  %v1079_v51 = vpop.f32.mrb[1].mxu0 }
 0x1f1   :  { %v1612_v53 = vadd.f32 %v1079_v51, %v951_v45  ;;  %v1081_v54 = vpop.f32.mrb[2].mxu0 }
 0x1f2   :  { %v1614_v55 = vadd.f32 %v1081_v54, %v953_v49  ;;  %v1083_v56 = vpop.f32.mrb[3].mxu0  ;;  %v1086_v58 = vmax.f32 %v1610_v50, 0.0 }
 0x1f3   :  { %v1616_v57 = vadd.f32 %v1083_v56, %v955_v52  ;;  %v1087_v60 = vmax.f32 %v1612_v53, 0.0 }
 0x1f4   :  { %v1088_v59 = vmax.f32 %v1614_v55, 0.0 }
 0x1f5   :  { %v1089_v61 = vmax.f32 %v1616_v57, 0.0 }
 0x1f6   :  { %v1090_v62 = vpack.c.bf16 %v1088_v59, %v1086_v58 }
 0x1f7   :  { %v1091_v63 = vpack.c.bf16 %v1089_v61, %v1087_v60 }
 0x1f9   :  { %1256 = vmatprep.mubr.bf16.mxu1 %v1091_v63 }
 0x1fa   :  { %1257 = vmatmul.mubr.bf16.vlgmr.msra.gmra.mrb[4].mxu1 %v1090_v62 }
 0x1fb   :  { %1590 = vmatpush3.bf16.msra.mxu1 %v1847_v0  ;;  %1605 = vmatprep.mubr.msk.bf16.mxu1 %vm2007_vm0, %v2006_v32 }
 0x1fc   :  { %1591 = vmatprep.subr.bf16.mxu1 %v2006_v32 }
 0x1ff   :  { %1592 = vmatpush3.bf16.msra.mxu1 %v1848_v47 }
 0x200   :  { %1593 = vmatprep.subr.bf16.mxu1 %v2006_v32 }
 0x203   :  { %1594 = vmatpush3.bf16.msra.mxu1 %v1849_v48 }
 0x204   :  { %1595 = vmatprep.subr.bf16.mxu1 %v2006_v32 }
 0x207   :  { %1596 = vmatpush3.bf16.msra.mxu1 %v1850_v1 }
 0x208   :  { %1597 = vmatprep.subr.bf16.mxu1 %v2006_v32 }
 0x20b   :  { %1598 = vmatpush3.bf16.msra.mxu1 %v1851_v2 }
 0x20c   :  { %1599 = vmatprep.subr.bf16.mxu1 %v2006_v32 }
 0x20f   :  { %1600 = vmatpush3.bf16.msra.mxu1 %v1852_v3 }
 0x210   :  { %1601 = vmatprep.subr.bf16.mxu1 %v2006_v32 }
 0x213   :  { %1602 = vmatpush3.bf16.msra.mxu1 %v1853_v4 }
 0x214   :  { %1603 = vmatprep.subr.bf16.mxu1 %v2006_v32 }
 0x217   :  { %1604 = vmatpush3.bf16.msra.mxu1 %v1854_v5 }
 0x2cd   :  { %v1574_v7 = vpop.f32.mrb[4].mxu1 }
 0x2ce   :  { %v1575_v9 = vpop.f32.mrb[5].mxu1 }
 0x2cf   :  { %v1576_v10 = vadd.f32 %v1575_v9, %v1574_v7  ;;  %v1577_v11 = vpop.f32.mrb[6].mxu1 }
 0x2d0   :  { %v1578_v12 = vpop.f32.mrb[7].mxu1 }
 0x2d1   :  { %v1259_v13 = vadd.f32 %v1576_v10, %v1127_v8  ;;  %v1579_v14 = vadd.f32 %v1578_v12, %v1577_v11 }
 0x2d3   :  { %v1262_v15 = vadd.f32 %v1579_v14, %v1127_v8  ;;  %v1265_v16 = vmax.f32 %v1259_v13, 0.0 }
 0x2d5   :  { %v1266_v17 = vmax.f32 %v1262_v15, 0.0 }
 0x2d7   :  { %v1267_v18 = vpack.c.bf16 %v1266_v17, %v1265_v16 }
 0x2d9   :  { %1606 = vmatmul.mubr.bf16.vlgmr.msra.gmra.mrb[8].mxu1 %v1267_v18 }
 0x3ac   :  { %v1370_v21 = vpop.f32.mrb[8].mxu1 }
 0x3ad   :  { %v1371_v22 = vadd.f32 %v1370_v21, %v1287_v20  ;;  %v1607_v23 = vpop.f32.mrb[9].mxu1 }
 0x3ae   :  { %v1373_v24 = vpop.f32.mrb[10].mxu1 }
 0x3af   :  { %1377 = vst [vmem:[#allocation11] sm:$0xff] %v1371_v22  ;;  %v1374_v25 = vadd.f32 %v1373_v24, %v1287_v20  ;;  %v1608_v26 = vpop.f32.mrb[11].mxu1 }
 0x3b1   :  { %1378 = vst [vmem:[#allocation11 + $0x8] sm:$0xff] %v1374_v25 }
 0x3b2   :  { %1976 = shalt.err (!%p1973_p2)
}
 0x3b3   :  { %s1977_s12 = scalar_lea.hbm %s2162_s5, 256 }
 0x3b4   :  { %p1978_p3 = scmp.ne.s32.totalorder %s2162_s5, %s1977_s12  ;;  %p1981_p4 = scmp.lt.u32.totalorder %s1977_s12, %s2162_s5 }
 0x3b6   :  { %p1983_p5 = pnand %p1981_p4, %p1978_p3 }
 0x3b8   :  { %1986 = shalt.err (!%p1983_p5)
}
 0x3b9   :  { %1390 = dma.vmem_to_hbm [thread:$0]  %s1385_s19, 256, %s2162_s5, [#allocation4], %s1996_s28, %s1996_s28, %s1997_s29  }
 0x3ba   :  { %1993 = dma.done.wait [#allocation4], 256  }
 0x3bb   :  { %1994 = vsyncadd [#allocation4], 4294967040 }
 0x3bc   :  { %1394 = vsyncpa [#allocation3], 1 }
 0x3bd   :  { %1395 = vsyncpa [#allocation6], 1 }
 0x3be   :  { %1396 = vsyncpa [#allocation9], 1 }
 0x3bf   :  { %1397 = vsyncpa [#allocation4], 1 }

</bundles_post_ra>
